<compile_context>
chip_gen: v7x
topology: tpu7x:2x2x1
jax: 0.10.0
libtpu: 0.0.40
codegen_flags: <defaults>
</compile_context>

<pallas_src>
import jax
import jax.numpy as jnp
from jax.experimental import pallas as pl
from jax.experimental.pallas import tpu as pltpu

LANE = 128      # vreg lane width
SUBLANE = 8     # f32 sublane granularity


def _round_up(n, m):
    return ((n + m - 1) // m) * m


def _cdiv(a, b):
    return (a + b - 1) // b


# ----------------------------- fused Pallas kernel --------------------------

def _make_fused_dqn_kernel(num_hidden, true_dims, pad_dims, matmul_dtype):
    """Build a kernel closed over the static layer structure.

    true_dims / pad_dims: per-layer OUTPUT feature counts (hidden..., output).
    Ref layout per call:
      x_ref, w_0, ..., w_{num_hidden}, vec_ref, o_ref
    Padded weight rows/cols and padded lanes of the packed vectors are zero,
    so padded lanes stay exactly 0 through every layer.
    """

    def kernel(x_ref, *refs):
        w_refs = refs[:num_hidden + 1]
        vec_ref = refs[num_hidden + 1]      # (rows_pad, Dmax) f32: b/g/beta..., b_out
        o_ref = refs[-1]

        h = x_ref[...]                      # (tile_b, d_in_pad) f32
        for li in range(num_hidden):
            d_true, d_pad = true_dims[li], pad_dims[li]
            # bf16 MXU matmul, f32 accumulation.
            y = jnp.dot(h.astype(matmul_dtype), w_refs[li][...],
                        preferred_element_type=jnp.float32)
            row = 3 * li
            y = y + vec_ref[row:row + 1, :d_pad]          # bias (padded lanes 0)

            # LayerNorm over the TRUE feature count. Padded lanes of y are 0,
            # so centered's padded lanes are exactly -mean; correct the sum of
            # squares with a per-row scalar instead of a full-tile lane mask.
            inv_d = 1.0 / float(d_true)
            mean = jnp.sum(y, axis=-1, keepdims=True) * inv_d
            centered = y - mean
            ssq = jnp.sum(centered * centered, axis=-1, keepdims=True)
            pad_count = d_pad - d_true
            if pad_count:
                ssq = ssq - float(pad_count) * (mean * mean)
            inv_std = jax.lax.rsqrt(ssq * inv_d + 1e-5)

            g = vec_ref[row + 1:row + 2, :d_pad]          # gamma (padded lanes 0)
            beta = vec_ref[row + 2:row + 3, :d_pad]       # beta  (padded lanes 0)
            h = jnp.maximum(centered * inv_std * g + beta, 0.0)
            # TODO(synk): training-mode dropout would go here.

        d_out_pad = pad_dims[num_hidden]
        out = jnp.dot(h.astype(matmul_dtype), w_refs[num_hidden][...],
                      preferred_element_type=jnp.float32)
        out = out + vec_ref[3 * num_hidden:3 * num_hidden + 1, :d_out_pad]
        o_ref[...] = out.astype(o_ref.dtype)

    return kernel


# ----------------------------- parameter handling ---------------------------

def xavier_uniform(key, fan_in, fan_out):
    """Matches nn.init.xavier_uniform_ on a (out, in) weight; stored as (in, out)."""
    limit = (6.0 / (fan_in + fan_out)) ** 0.5
    return jax.random.uniform(key, (fan_in, fan_out), jnp.float32, -limit, limit)


def init_params(key, input_dim, output_dim, hidden_layers):
    """PyTorch-faithful (unpadded, f32) parameters."""
    params = []
    prev = input_dim
    for h in hidden_layers:
        key, wk = jax.random.split(key)
        params.append(dict(
            w=xavier_uniform(wk, prev, h),
            b=jnp.zeros((h,), jnp.float32),          # constant_(bias, 0)
            gamma=jnp.ones((h,), jnp.float32),       # LayerNorm default affine
            beta=jnp.zeros((h,), jnp.float32),
        ))
        prev = h
    key, wk = jax.random.split(key)
    params.append(dict(
        w=xavier_uniform(wk, prev, output_dim),
        b=jnp.zeros((output_dim,), jnp.float32),
    ))
    return params


def _padded_dims(input_dim, output_dim, hidden_layers):
    dims = [input_dim] + list(hidden_layers) + [output_dim]
    # Input dim: sublane pad only (last block dim == full array dim is legal).
    pdims = [_round_up(input_dim, SUBLANE)] + [_round_up(d, LANE) for d in dims[1:]]
    return dims, pdims


def pack_params(params, input_dim, output_dim, hidden_layers,
                matmul_dtype=jnp.bfloat16):
    """Zero-pad weights (-> matmul_dtype) and pack all 1-D vectors into one
    f32 (rows_pad, Dmax) array: rows 3i/3i+1/3i+2 = b/gamma/beta of hidden
    layer i, row 3*num_hidden = output bias."""
    dims, pdims = _padded_dims(input_dim, output_dim, hidden_layers)
    num_hidden = len(hidden_layers)

    weights = []
    for li, layer in enumerate(params):
        din, dout = dims[li], dims[li + 1]
        pin, pout = pdims[li], pdims[li + 1]
        w = jnp.zeros((pin, pout), jnp.float32).at[:din, :dout].set(layer["w"])
        weights.append(w.astype(matmul_dtype))

    dmax = max(pdims[1:])
    rows_pad = _round_up(3 * num_hidden + 1, SUBLANE)
    vecs = jnp.zeros((rows_pad, dmax), jnp.float32)
    for li, layer in enumerate(params[:-1]):
        dout = dims[li + 1]
        vecs = vecs.at[3 * li, :dout].set(layer["b"])
        vecs = vecs.at[3 * li + 1, :dout].set(layer["gamma"])
        vecs = vecs.at[3 * li + 2, :dout].set(layer["beta"])
    vecs = vecs.at[3 * num_hidden, :output_dim].set(params[-1]["b"])
    return tuple(weights), vecs


# ----------------------------- forward wrapper -------------------------------

def make_dqn_forward(input_dim, output_dim, hidden_layers,
                     max_tile_b=256, matmul_dtype=jnp.bfloat16):
    """Returns a jitted forward(weights, vecs, x) -> (B, output_dim) f32."""
    num_hidden = len(hidden_layers)
    dims, pdims = _padded_dims(input_dim, output_dim, hidden_layers)
    d_in_pad, d_out_pad = pdims[0], pdims[-1]
    kernel = _make_fused_dqn_kernel(num_hidden, tuple(dims[1:]), tuple(pdims[1:]),
                                    matmul_dtype)

    def forward(weights, vecs, x):
        B = x.shape[0]
        # Balanced batch tiles (waste <= 7 rows/tile); >=2 grid steps when
        # B >= 16 so both v7x TensorCores get work; tile capped at max_tile_b
        # so the LN chain fits the vreg file without spilling.
        n_tiles = max(_cdiv(B, max_tile_b), 2 if B >= 16 else 1)
        tile_b = _round_up(_cdiv(B, n_tiles), SUBLANE)
        b_pad = tile_b * n_tiles

        x = x.astype(jnp.float32)
        if b_pad != B or d_in_pad != input_dim:
            x = jnp.pad(x, ((0, b_pad - B), (0, d_in_pad - input_dim)))

        in_specs = [pl.BlockSpec((tile_b, d_in_pad), lambda i: (i, 0))]
        for w in weights:
            # Whole weight resident in VMEM across all batch tiles.
            # NOTE: constant-index blocks are still double-buffered; at
            # multi-thousand hidden dims set pipeline_mode=pl.Buffered(1) or
            # raise vmem_limit_bytes (watch v7x's 64 MiB / 32 MiB scoped).
            in_specs.append(pl.BlockSpec(w.shape, lambda i: (0, 0)))
        in_specs.append(pl.BlockSpec(vecs.shape, lambda i: (0, 0)))
        out_spec = pl.BlockSpec((tile_b, d_out_pad), lambda i: (i, 0))

        # Advisory cost estimate with TRUE (unpadded) dims.
        flops = 2 * B * sum(dims[i] * dims[i + 1] for i in range(len(dims) - 1))
        w_bytes = jnp.dtype(matmul_dtype).itemsize * sum(
            dims[i] * dims[i + 1] for i in range(len(dims) - 1))
        bytes_accessed = (4 * B * (input_dim + output_dim) + w_bytes
                          + 4 * (3 * sum(hidden_layers) + output_dim))

        out = pl.pallas_call(
            kernel,
            out_shape=jax.ShapeDtypeStruct((b_pad, d_out_pad), jnp.float32),
            grid=(n_tiles,),
            in_specs=in_specs,
            out_specs=out_spec,
            compiler_params=pltpu.CompilerParams(
                dimension_semantics=("parallel",)),
            cost_estimate=pl.CostEstimate(
                flops=int(flops),
                transcendentals=int(B * num_hidden),
                bytes_accessed=int(bytes_accessed)),
        )(x, *weights, vecs)

        # For large B a consumer can take the padded (b_pad, d_out_pad) output
        # directly to skip this extra slice/copy; tiny at demo scale.
        return out[:B, :output_dim]

    return jax.jit(forward)


# ----------------------------- pure-JAX reference ----------------------------

def reference_forward(params, x, matmul_dtype=jnp.float32):
    h = x
    for layer in params[:-1]:
        y = jnp.dot(h.astype(matmul_dtype), layer["w"].astype(matmul_dtype),
                    preferred_element_type=jnp.float32) + layer["b"]
        mean = jnp.mean(y, axis=-1, keepdims=True)
        var = jnp.mean((y - mean) ** 2, axis=-1, keepdims=True)
        y = (y - mean) / jnp.sqrt(var + 1e-5)
        h = jnp.maximum(y * layer["gamma"] + layer["beta"], 0.0)
    last = params[-1]
    return jnp.dot(h.astype(matmul_dtype), last["w"].astype(matmul_dtype),
                   preferred_element_type=jnp.float32) + last["b"]


if __name__ == "__main__":
    key = jax.random.PRNGKey(0)

    input_dim = 32
    output_dim = 8
    hidden_layers = (64, 32)
    batch = 16

    pkey, xkey = jax.random.split(key)
    params = init_params(pkey, input_dim, output_dim, hidden_layers)
    weights, vecs = pack_params(params, input_dim, output_dim, hidden_layers,
                                matmul_dtype=jnp.bfloat16)
    x = jax.random.normal(xkey, (batch, input_dim), jnp.float32)

    forward = make_dqn_forward(input_dim, output_dim, hidden_layers,
                               matmul_dtype=jnp.bfloat16)
    out = jax.block_until_ready(forward(weights, vecs, x))

    ref_bf16 = reference_forward(params, x, matmul_dtype=jnp.bfloat16)
    ref_f32 = reference_forward(params, x)

    assert out.shape == (batch, output_dim)
    # Tight check vs a reference using the same bf16 matmul inputs / f32 accum.
    assert jnp.allclose(out, ref_bf16, atol=1e-3, rtol=1e-3), \
        "mismatch vs bf16-matmul reference"
    # Loose sanity check vs the pure-f32 PyTorch-equivalent math.
    assert jnp.allclose(out, ref_f32, atol=2e-1, rtol=2e-1), \
        "mismatch vs f32 reference"
    print("KERNEL_OK")
</pallas_src>

<mosaic_0001>
module attributes {stable_mosaic.version = 11 : i64} {
  func.func @kernel(%arg0: i32, %arg1: memref<8x32xf32, #tpu.memory_space<vmem>>, %arg2: memref<32x128xbf16, #tpu.memory_space<vmem>>, %arg3: memref<128x128xbf16, #tpu.memory_space<vmem>>, %arg4: memref<128x128xbf16, #tpu.memory_space<vmem>>, %arg5: memref<8x128xf32, #tpu.memory_space<vmem>>, %arg6: memref<8x128xf32, #tpu.memory_space<vmem>>) attributes {dimension_semantics = [#tpu.dimension_semantics<parallel>], iteration_bounds = array<i64: 2>, scalar_prefetch = 0 : i64, scratch_operands = 0 : i64, tpu.core_type = #tpu.core_type<tc>, window_params = [{transform_indices = @transform_0, window_bounds = array<i64: 8, 32>}, {pipeline_mode = #tpu.pipeline_mode<synchronous>, transform_indices = @transform_1, window_bounds = array<i64: 32, 128>}, {pipeline_mode = #tpu.pipeline_mode<synchronous>, transform_indices = @transform_2, window_bounds = array<i64: 128, 128>}, {pipeline_mode = #tpu.pipeline_mode<synchronous>, transform_indices = @transform_3, window_bounds = array<i64: 128, 128>}, {pipeline_mode = #tpu.pipeline_mode<synchronous>, transform_indices = @transform_4, window_bounds = array<i64: 8, 128>}, {transform_indices = @transform_5, window_bounds = array<i64: 8, 128>}]} {
    %c0 = arith.constant 0 : index
    %c0_0 = arith.constant 0 : index
    %0 = vector.load %arg1[%c0, %c0_0] : memref<8x32xf32, #tpu.memory_space<vmem>>, vector<8x32xf32>
    %1 = arith.truncf %0 : vector<8x32xf32> to vector<8x32xbf16>
    %c0_1 = arith.constant 0 : index
    %c0_2 = arith.constant 0 : index
    %2 = vector.load %arg2[%c0_1, %c0_2] : memref<32x128xbf16, #tpu.memory_space<vmem>>, vector<32x128xbf16>
    %cst = arith.constant dense<0.000000e+00> : vector<8x128xf32>
    %3 = tpu.matmul %1, %2, %cst {dimension_numbers = #tpu.dot_dimension_numbers<[1], [0], [0], [1], [0, 0, 1, 1], [], []>} : vector<8x32xbf16>, vector<32x128xbf16>, vector<8x128xf32> -> vector<8x128xf32>
    %c0_3 = arith.constant 0 : index
    %c0_4 = arith.constant 0 : index
    %4 = vector.load %arg5[%c0_3, %c0_4] : memref<8x128xf32, #tpu.memory_space<vmem>>, vector<1x128xf32>
    %5 = vector.broadcast %4 : vector<1x128xf32> to vector<8x128xf32>
    %6 = arith.addf %3, %5 : vector<8x128xf32>
    %cst_5 = arith.constant dense<0.000000e+00> : vector<8xf32>
    %7 = vector.multi_reduction <add>, %6, %cst_5 [1] : vector<8x128xf32> to vector<8xf32>
    %8 = vector.shape_cast %7 : vector<8xf32> to vector<8x1xf32>
    %cst_6 = arith.constant 1.562500e-02 : f32
    %9 = vector.broadcast %cst_6 : f32 to vector<8x1xf32>
    %10 = arith.mulf %8, %9 : vector<8x1xf32>
    %11 = vector.broadcast %10 : vector<8x1xf32> to vector<8x128xf32>
    %12 = arith.subf %6, %11 : vector<8x128xf32>
    %13 = arith.mulf %12, %12 : vector<8x128xf32>
    %cst_7 = arith.constant dense<0.000000e+00> : vector<8xf32>
    %14 = vector.multi_reduction <add>, %13, %cst_7 [1] : vector<8x128xf32> to vector<8xf32>
    %15 = vector.shape_cast %14 : vector<8xf32> to vector<8x1xf32>
    %16 = arith.mulf %10, %10 : vector<8x1xf32>
    %cst_8 = arith.constant 6.400000e+01 : f32
    %17 = vector.broadcast %cst_8 : f32 to vector<8x1xf32>
    %18 = arith.mulf %17, %16 : vector<8x1xf32>
    %19 = arith.subf %15, %18 : vector<8x1xf32>
    %cst_9 = arith.constant 1.562500e-02 : f32
    %20 = vector.broadcast %cst_9 : f32 to vector<8x1xf32>
    %21 = arith.mulf %19, %20 : vector<8x1xf32>
    %cst_10 = arith.constant 9.99999974E-6 : f32
    %22 = vector.broadcast %cst_10 : f32 to vector<8x1xf32>
    %23 = arith.addf %21, %22 : vector<8x1xf32>
    %24 = math.rsqrt %23 : vector<8x1xf32>
    %c1 = arith.constant 1 : index
    %c0_11 = arith.constant 0 : index
    %25 = vector.load %arg5[%c1, %c0_11] : memref<8x128xf32, #tpu.memory_space<vmem>>, vector<1x128xf32>
    %c2 = arith.constant 2 : index
    %c0_12 = arith.constant 0 : index
    %26 = vector.load %arg5[%c2, %c0_12] : memref<8x128xf32, #tpu.memory_space<vmem>>, vector<1x128xf32>
    %27 = vector.broadcast %24 : vector<8x1xf32> to vector<8x128xf32>
    %28 = arith.mulf %12, %27 : vector<8x128xf32>
    %29 = vector.broadcast %25 : vector<1x128xf32> to vector<8x128xf32>
    %30 = arith.mulf %28, %29 : vector<8x128xf32>
    %31 = vector.broadcast %26 : vector<1x128xf32> to vector<8x128xf32>
    %32 = arith.addf %30, %31 : vector<8x128xf32>
    %cst_13 = arith.constant 0.000000e+00 : f32
    %33 = vector.broadcast %cst_13 : f32 to vector<8x128xf32>
    %34 = arith.maximumf %32, %33 : vector<8x128xf32>
    %35 = arith.truncf %34 : vector<8x128xf32> to vector<8x128xbf16>
    %c0_14 = arith.constant 0 : index
    %c0_15 = arith.constant 0 : index
    %36 = vector.load %arg3[%c0_14, %c0_15] : memref<128x128xbf16, #tpu.memory_space<vmem>>, vector<128x128xbf16>
    %cst_16 = arith.constant dense<0.000000e+00> : vector<8x128xf32>
    %37 = tpu.matmul %35, %36, %cst_16 {dimension_numbers = #tpu.dot_dimension_numbers<[1], [0], [0], [1], [0, 0, 1, 1], [], []>} : vector<8x128xbf16>, vector<128x128xbf16>, vector<8x128xf32> -> vector<8x128xf32>
    %c3 = arith.constant 3 : index
    %c0_17 = arith.constant 0 : index
    %38 = vector.load %arg5[%c3, %c0_17] : memref<8x128xf32, #tpu.memory_space<vmem>>, vector<1x128xf32>
    %39 = vector.broadcast %38 : vector<1x128xf32> to vector<8x128xf32>
    %40 = arith.addf %37, %39 : vector<8x128xf32>
    %cst_18 = arith.constant dense<0.000000e+00> : vector<8xf32>
    %41 = vector.multi_reduction <add>, %40, %cst_18 [1] : vector<8x128xf32> to vector<8xf32>
    %42 = vector.shape_cast %41 : vector<8xf32> to vector<8x1xf32>
    %cst_19 = arith.constant 3.125000e-02 : f32
    %43 = vector.broadcast %cst_19 : f32 to vector<8x1xf32>
    %44 = arith.mulf %42, %43 : vector<8x1xf32>
    %45 = vector.broadcast %44 : vector<8x1xf32> to vector<8x128xf32>
    %46 = arith.subf %40, %45 : vector<8x128xf32>
    %47 = arith.mulf %46, %46 : vector<8x128xf32>
    %cst_20 = arith.constant dense<0.000000e+00> : vector<8xf32>
    %48 = vector.multi_reduction <add>, %47, %cst_20 [1] : vector<8x128xf32> to vector<8xf32>
    %49 = vector.shape_cast %48 : vector<8xf32> to vector<8x1xf32>
    %50 = arith.mulf %44, %44 : vector<8x1xf32>
    %cst_21 = arith.constant 9.600000e+01 : f32
    %51 = vector.broadcast %cst_21 : f32 to vector<8x1xf32>
    %52 = arith.mulf %51, %50 : vector<8x1xf32>
    %53 = arith.subf %49, %52 : vector<8x1xf32>
    %cst_22 = arith.constant 3.125000e-02 : f32
    %54 = vector.broadcast %cst_22 : f32 to vector<8x1xf32>
    %55 = arith.mulf %53, %54 : vector<8x1xf32>
    %cst_23 = arith.constant 9.99999974E-6 : f32
    %56 = vector.broadcast %cst_23 : f32 to vector<8x1xf32>
    %57 = arith.addf %55, %56 : vector<8x1xf32>
    %58 = math.rsqrt %57 : vector<8x1xf32>
    %c4 = arith.constant 4 : index
    %c0_24 = arith.constant 0 : index
    %59 = vector.load %arg5[%c4, %c0_24] : memref<8x128xf32, #tpu.memory_space<vmem>>, vector<1x128xf32>
    %c5 = arith.constant 5 : index
    %c0_25 = arith.constant 0 : index
    %60 = vector.load %arg5[%c5, %c0_25] : memref<8x128xf32, #tpu.memory_space<vmem>>, vector<1x128xf32>
    %61 = vector.broadcast %58 : vector<8x1xf32> to vector<8x128xf32>
    %62 = arith.mulf %46, %61 : vector<8x128xf32>
    %63 = vector.broadcast %59 : vector<1x128xf32> to vector<8x128xf32>
    %64 = arith.mulf %62, %63 : vector<8x128xf32>
    %65 = vector.broadcast %60 : vector<1x128xf32> to vector<8x128xf32>
    %66 = arith.addf %64, %65 : vector<8x128xf32>
    %cst_26 = arith.constant 0.000000e+00 : f32
    %67 = vector.broadcast %cst_26 : f32 to vector<8x128xf32>
    %68 = arith.maximumf %66, %67 : vector<8x128xf32>
    %69 = arith.truncf %68 : vector<8x128xf32> to vector<8x128xbf16>
    %c0_27 = arith.constant 0 : index
    %c0_28 = arith.constant 0 : index
    %70 = vector.load %arg4[%c0_27, %c0_28] : memref<128x128xbf16, #tpu.memory_space<vmem>>, vector<128x128xbf16>
    %cst_29 = arith.constant dense<0.000000e+00> : vector<8x128xf32>
    %71 = tpu.matmul %69, %70, %cst_29 {dimension_numbers = #tpu.dot_dimension_numbers<[1], [0], [0], [1], [0, 0, 1, 1], [], []>} : vector<8x128xbf16>, vector<128x128xbf16>, vector<8x128xf32> -> vector<8x128xf32>
    %c6 = arith.constant 6 : index
    %c0_30 = arith.constant 0 : index
    %72 = vector.load %arg5[%c6, %c0_30] : memref<8x128xf32, #tpu.memory_space<vmem>>, vector<1x128xf32>
    %73 = vector.broadcast %72 : vector<1x128xf32> to vector<8x128xf32>
    %74 = arith.addf %71, %73 : vector<8x128xf32>
    %c0_31 = arith.constant 0 : index
    %c0_32 = arith.constant 0 : index
    %75 = vector.load %arg6[%c0_31, %c0_32] : memref<8x128xf32, #tpu.memory_space<vmem>>, vector<8x128xf32>
    tpu.vector_store %arg6[%c0_31, %c0_32], %74 {strides = array<i32>} : memref<8x128xf32, #tpu.memory_space<vmem>>, vector<8x128xf32>,
    return
  }
  func.func @transform_0(%arg0: i32) -> (i32, i32) {
    %c0_i32 = arith.constant 0 : i32
    %c0_i32_0 = arith.constant 0 : i32
    return %arg0, %c0_i32 : i32, i32
  }
  func.func @transform_1(%arg0: i32) -> (i32, i32) {
    %c0_i32 = arith.constant 0 : i32
    %c0_i32_0 = arith.constant 0 : i32
    %c0_i32_1 = arith.constant 0 : i32
    return %c0_i32, %c0_i32_0 : i32, i32
  }
  func.func @transform_2(%arg0: i32) -> (i32, i32) {
    %c0_i32 = arith.constant 0 : i32
    %c0_i32_0 = arith.constant 0 : i32
    %c0_i32_1 = arith.constant 0 : i32
    return %c0_i32, %c0_i32_0 : i32, i32
  }
  func.func @transform_3(%arg0: i32) -> (i32, i32) {
    %c0_i32 = arith.constant 0 : i32
    %c0_i32_0 = arith.constant 0 : i32
    %c0_i32_1 = arith.constant 0 : i32
    return %c0_i32, %c0_i32_0 : i32, i32
  }
  func.func @transform_4(%arg0: i32) -> (i32, i32) {
    %c0_i32 = arith.constant 0 : i32
    %c0_i32_0 = arith.constant 0 : i32
    %c0_i32_1 = arith.constant 0 : i32
    return %c0_i32, %c0_i32_0 : i32, i32
  }
  func.func @transform_5(%arg0: i32) -> (i32, i32) {
    %c0_i32 = arith.constant 0 : i32
    %c0_i32_0 = arith.constant 0 : i32
    return %arg0, %c0_i32 : i32, i32
  }
}

</mosaic_0001>

<bundles_post_ra>
// kernel: forward.1
= control target key start
LH: loop header
LB: loop body
LE: loop exit
PB: predicated region body
PF: predicated region fallthrough
CT: control target
= control target key end

     0   :  { %10 = vsyncpa [#allocation3], 0  ;;  %s1379_s0 = inlined_call_operand.hbm [shape: f32[16,32], index: 0, kind: input, shape index: {}]   ;;  %s1380_s1 = inlined_call_operand.hbm [shape: bf16[32,128], index: 1, kind: input, shape index: {}]   ;;  %s1381_s2 = inlined_call_operand.hbm [shape: bf16[128,128], index: 2, kind: input, shape index: {}]   ;;  %s1382_s3 = inlined_call_operand.hbm [shape: bf16[128,128], index: 3, kind: input, shape index: {}]   ;;  %s1383_s4 = inlined_call_operand.vmem [shape: f32[8,128], index: 4, kind: input, shape index: {}]   ;;  %s1384_s5 = inlined_call_operand.vmem [shape: f32[16,128], index: 5, kind: output, shape index: {}]  }
   0x1   :  { %12 = vsyncpa [#allocation3 + $0x1], 0 }
   0x2   :  { %13 = vsyncpa [#allocation5], 0 }
   0x3   :  { %14 = vsyncpa [#allocation8], 0  ;;  %s1124_s18 = smov 0   ;;  %s1126_s19 = smov 0  }
   0x4   :  { %s1128_s20 = smov 0   ;;  %s1130_s21 = smov 0  }
   0x5 LB: > { %s1143_s22 = sadd.s32 4294967295, %s1084_s21   ;;  %p40_p0 = scmp.ne.s32.totalorder %s1076_s19, %s1072_s18  ;;  %s1084_s21 = sphi %s1130_s21, %s1402_s21   ;;  %s1080_s20 = sphi %s1128_s20, %s1401_s20   ;;  %s1076_s19 = sphi %s1126_s19, %s1400_s19   ;;  %s1072_s18 = sphi %s1124_s18, %s1399_s18  }
   0x6   : > { %p1385_p1 = scmp.eq.s32.totalorder %s1143_s22, 0  ;;  %p722_p2 = scmp.ge.s32.totalorder %s1084_s21, 1 }
   0x7   : > { %p161_p3 = scmp.lt.s32.totalorder %s1084_s21, 3  ;;  %s1086_s25 = smov [#allocation4]  }
   0x8   : > { %p1151_p4 = por %p1385_p1, %p40_p0  ;;  %s173_s26 = sshll.u32 %s1086_s25, 4  ;;  %s1159_s26 = int_to_ptr.vmem [resolvable:$true] %s173_s26 }
   0x9   : > { %p1155_p5 = pnand %p722_p2, %p161_p3  ;;  %s1087_s28 = smov [#allocation6]  }
   0xa   : > { %s1388_s23 = scalar_select %p1151_p4, 1, 0 }
   0xb   : > { %s1389_s24 = scalar_select %p1155_p5, 1, 0 }
   0xc   : > { %p846_p6 = pneg %p1155_p5  ;;  %s186_s29 = sshll.u32 %s1087_s28, 4  ;;  %s1169_s29 = int_to_ptr.vmem [resolvable:$true] %s186_s29 }
   0xd   : > { %s1088_s30 = smov [#allocation7]   ;;  %s928_s9 = scalar_lea.hbm %s1380_s1, 256 }
   0xe   : > { %p1165_p7 = pnand %p846_p6, %p1385_p1  ;;  %s1171_s6 = sshll.u32 %s1088_s30, 4  ;;  %s200_s6 = int_to_ptr.vmem [resolvable:$true] %s1171_s6 }
   0xf   : > { %p929_p8 = scmp.ne.s32.totalorder %s1380_s1, %s928_s9  ;;  %p935_p12 = scmp.lt.u32.totalorder %s928_s9, %s1380_s1 }
  0x10   : > { %p1181_p9 = pneg %p1165_p7 }
  0x12   : > { %p931_p10 = pnand %p1181_p9, %p929_p8 }
  0x14   : > { %p932_p11 = pneg %p931_p10 }
  0x16   : > { %p937_p13 = pnand %p935_p12, %p932_p11 }
  0x18   : > { %940 = shalt.err (!%p937_p13)
}
  0x19   : > { %s941_s15 = scalar_lea.vmem %s1159_s26, 256  ;;  %p949_p6 = scmp.lt.s32.totalorder %s1159_s26, %s1159_s26 }
  0x1a   : > { %p942_p0 = scmp.ne.s32.totalorder %s1159_s26, %s941_s15  ;;  %p950_p1 = scmp.lt.s32.totalorder %s941_s15, %s941_s15 }
  0x1c   : > { %p944_p2 = pnand %p942_p0, %p1181_p9  ;;  %p951_p8 = por %p950_p1, %p949_p6 }
  0x1e   : > { %p945_p3 = pneg %p944_p2 }
  0x20   : > { %p952_p10 = pnand %p951_p8, %p945_p3 }
  0x22   : > { %955 = shalt.err (!%p952_p10)
}
  0x23   : > { %s1089_s16 = smov 64   ;;  %s1090_s17 = smov 4  }
  0x24   : > { %849 = dma.hbm_to_vmem [thread:$0]  (!%p1165_p7), %s1380_s1, 256, %s1159_s26, [#allocation5], %s1089_s16, %s1089_s16, %s1090_s17  }
  0x25   : > { %s956_s7 = scalar_lea.hbm %s1381_s2, 1024 }
  0x26   : > { %p957_p1 = scmp.ne.s32.totalorder %s1381_s2, %s956_s7  ;;  %p963_p13 = scmp.lt.u32.totalorder %s956_s7, %s1381_s2 }
  0x28   : > { %p959_p11 = pnand %p957_p1, %p1181_p9 }
  0x2a   : > { %p960_p12 = pneg %p959_p11 }
  0x2c   : > { %p965_p0 = pnand %p963_p13, %p960_p12 }
  0x2e   : > { %968 = shalt.err (!%p965_p0)
}
  0x2f   : > { %s969_s26 = scalar_lea.vmem %s1169_s29, 1024  ;;  %p977_p8 = scmp.lt.s32.totalorder %s1169_s29, %s1169_s29 }
  0x30   : > { %p970_p2 = scmp.ne.s32.totalorder %s1169_s29, %s969_s26  ;;  %p978_p10 = scmp.lt.s32.totalorder %s969_s26, %s969_s26 }
  0x32   : > { %p972_p3 = pnand %p970_p2, %p1181_p9  ;;  %p979_p1 = por %p978_p10, %p977_p8 }
  0x34   : > { %p973_p6 = pneg %p972_p3 }
  0x36   : > { %p980_p11 = pnand %p979_p1, %p973_p6 }
  0x38   : > { %983 = shalt.err (!%p980_p11)
}
  0x39   : > { %852 = dma.hbm_to_vmem [thread:$0]  (!%p1165_p7), %s1381_s2, 1024, %s1169_s29, [#allocation5], %s1089_s16, %s1089_s16, %s1090_s17  }
  0x3a   : > { %s984_s25 = scalar_lea.hbm %s1382_s3, 1024 }
  0x3b   : > { %p985_p12 = scmp.ne.s32.totalorder %s1382_s3, %s984_s25  ;;  %p991_p2 = scmp.lt.u32.totalorder %s984_s25, %s1382_s3 }
  0x3d   : > { %p987_p13 = pnand %p985_p12, %p1181_p9 }
  0x3f   : > { %p988_p0 = pneg %p987_p13 }
  0x41   : > { %p993_p3 = pnand %p991_p2, %p988_p0 }
  0x43   : > { %996 = shalt.err (!%p993_p3)
}
  0x44   : > { %s997_s9 = scalar_lea.vmem %s200_s6, 1024  ;;  %p1005_p1 = scmp.lt.s32.totalorder %s200_s6, %s200_s6 }
  0x45   : > { %p998_p6 = scmp.ne.s32.totalorder %s200_s6, %s997_s9  ;;  %p1006_p11 = scmp.lt.s32.totalorder %s997_s9, %s997_s9 }
  0x47   : > { %p1000_p8 = pnand %p998_p6, %p1181_p9  ;;  %p1007_p4 = por %p1006_p11, %p1005_p1 }
  0x49   : > { %p1001_p10 = pneg %p1000_p8 }
  0x4b   : > { %p1008_p5 = pnand %p1007_p4, %p1001_p10 }
  0x4d   : > { %1011 = shalt.err (!%p1008_p5)
}
  0x4e   : > { %855 = dma.hbm_to_vmem [thread:$0]  (!%p1165_p7), %s1382_s3, 1024, %s200_s6, [#allocation8], %s1089_s16, %s1089_s16, %s1090_s17  }
  0x4f   : > { %s1254_s12 = sadd.s32 1, %s1084_s21   ;;  %s27_s11 = sadd.s32 1, %s1080_s20 }
  0x50   : > { %s24_s27 = ssub.s32 %s1084_s21, %s1254_s12  ;;  %p34_p5 = scmp.ne.s32.totalorder %s1080_s20, %s1076_s19 }
  0x51   : > { %p25_p4 = scmp.eq.s32.totalorder %s24_s27, 0  ;;  %p35_p9 = scmp.eq.s32.totalorder %s1084_s21, 0 }
  0x52   : > { %p863_p12 = scmp.lt.s32.totalorder %s1084_s21, 2  ;;  %s216_s13 = sand.u32 1, %s1080_s20  }
  0x53   : > { %s1264_s26 = scalar_select %p25_p4, %s1080_s20, %s27_s11  }
  0x54   : > { %p36_p13 = por %p35_p9, %p34_p5  ;;  %s727_s14 = sshll.u32 %s216_s13, 3 }
  0x55   : > { %s728_s15 = sshll.u32 %s1084_s21, 7  ;;  %s220_s6 = scalar_lea.vmem [#allocation2], %s727_s14 }
  0x56   : > { %s1271_s28 = scalar_lea.hbm %s1379_s0, %s728_s15  ;;  %s227_s16 = sshll.u32 %s220_s6, 4  ;;  %s1273_s16 = int_to_ptr.vmem [resolvable:$true] %s227_s16 }
  0x57   : > { %p1275_p7 = pnand %p863_p12, %p36_p13  ;;  %s217_s21 = scalar_lea.sflag [#allocation3], %s216_s13 }
  0x58   : > { %s1012_s30 = scalar_lea.hbm %s1271_s28, 128  ;;  %s1017_s9 = scalar_lea.hbm %s1379_s0, 256 }
  0x59   : > { %p1013_p0 = scmp.ne.s32.totalorder %s1271_s28, %s1012_s30  ;;  %p1014_p2 = pneg %p1275_p7 }
  0x5a   : > { %p1018_p8 = scmp.lt.u32.totalorder %s1271_s28, %s1379_s0  ;;  %p1019_p10 = scmp.lt.u32.totalorder %s1017_s9, %s1012_s30 }
  0x5b   : > { %p1015_p3 = pnand %p1014_p2, %p1013_p0  ;;  %p1021_p11 = scmp.lt.u32.totalorder %s1012_s30, %s1271_s28 }
  0x5c   : > { %p1020_p1 = por %p1019_p10, %p1018_p8 }
  0x5d   : > { %p1016_p6 = pneg %p1015_p3 }
  0x5e   : > { %p1022_p4 = por %p1021_p11, %p1020_p1 }
  0x60   : > { %p1023_p5 = pnand %p1022_p4, %p1016_p6 }
  0x62   : > { %1026 = shalt.err (!%p1023_p5)
}
  0x63   : > { %s1027_s27 = scalar_lea.vmem %s1273_s16, 128  ;;  %s1091_s11 = smov [#allocation2]  }
  0x64   : > { %p1028_p9 = scmp.ne.s32.totalorder %s1273_s16, %s1027_s27  ;;  %s1032_s13 = sshll.u32 %s1091_s11, 4  ;;  %s1033_s13 = int_to_ptr.vmem [resolvable:$false] %s1032_s13 }
  0x65   : > { %s1034_s14 = scalar_lea.vmem %s1033_s13, 256  ;;  %p1035_p0 = scmp.lt.s32.totalorder %s1273_s16, %s1033_s13 }
  0x66   : > { %p1030_p12 = pnand %p1028_p9, %p1014_p2  ;;  %p1036_p3 = scmp.lt.s32.totalorder %s1034_s14, %s1027_s27 }
  0x68   : > { %p1031_p13 = pneg %p1030_p12  ;;  %p1037_p8 = por %p1036_p3, %p1035_p0 }
  0x6a   : > { %p1038_p10 = pnand %p1037_p8, %p1031_p13 }
  0x6c   : > { %1041 = shalt.err (!%p1038_p10)
}
  0x6d   : > { %859 = dma.hbm_to_vmem [thread:$0]  (!%p1275_p7), %s1271_s28, 128, %s1273_s16, %s217_s21  }
  0x6e   : > { %p1393_p6 = scmp.ne.s32.totalorder %s1389_s24, 0 }
  0x6f   : > { %s238_s15 = sand.u32 (!%p1393_p6), 1, %s1076_s19   ;;  %p1394_p2 = scmp.ne.s32.totalorder (!%p1393_p6), %s1388_s23, 0 }
  0x70   : > { %236 = sbr.rel (%p1393_p6) target bundleno = 1413 (0x585), region = 40  ;;  %s730_s18 = sshll.u32 (!%p1393_p6), %s238_s15, 3 }
  0x71   : > { %s239_s25 = scalar_lea.sflag (!%p1393_p6), [#allocation3], %s238_s15  ;;  %s242_s6 = scalar_lea.vmem (!%p1393_p6), [#allocation2], %s730_s18 }
  0x77   : > { %1059 = dma.done.wait (%p1394_p2), %s239_s25, 128  }
  0x78   : > { %1061 = vsyncadd (%p1394_p2), %s239_s25, 4294967168  ;;  %p1395_p1 = scmp.eq.s32.totalorder %s1143_s22, 0 }
  0x7a   : > { %1063 = dma.done.wait (%p1395_p1), [#allocation5], 1280   ;;  %p1396_p11 = pmov %p1395_p1 }
  0x7b   : > { %p1397_p7 = pmov %p1395_p1 }
  0x7c   : > { %1065 = vsyncadd (%p1396_p11), [#allocation5], 4294966016 }
  0x7d   : > { %1067 = dma.done.wait (%p1397_p7), [#allocation8], 1024   ;;  %p1398_p4 = pmov %p1395_p1 }
  0x7e   : > { %v1092_v0 = vmov 0.0   ;;  %vm1093_vm0 = vmmov 0   ;;  %v906_v1 = vld [vmem:[#allocation4] sm:$0xff]   ;;  %v907_v2 = vld [vmem:[#allocation4 + $0x8] sm:$0xff]   ;;  %v285_v3 = vld [vmem:[%s242_s6] sm:$0xff]  ;;  %vm308_vm1 = vcmask 261120  }
  0x7f   : > { %1069 = vsyncadd (%p1398_p4), [#allocation8], 4294966272  ;;  %784 = vmatprep.subr.bf16.mxu0 %v1092_v0  ;;  %788 = vmatprep.mubr.msk.bf16.mxu0 %vm1093_vm0, %v1092_v0  ;;  %v286_v4 = vpack.c.bf16 %v285_v3, %v285_v3  ;;  %v735_v5 = vld [vmem:[%s1383_s4] ss:$0 sm:$0xff]  ;;  %v909_v16 = vld [vmem:[#allocation6 + $0x8] sm:$0xff]   ;;  %p280_p5 = scmp.lt.s32.totalorder %s1143_s22, 1 }
  0x80   : > { %792 = vmatprep.subr.bf16.mxu1 %v1092_v0  ;;  %808 = vmatprep.mubr.msk.bf16.mxu1 %vm1093_vm0, %v1092_v0  ;;  %v908_v11 = vld [vmem:[#allocation6] sm:$0xff]   ;;  %v910_v17 = vld [vmem:[#allocation6 + $0x10] sm:$0xff]   ;;  %v911_v18 = vld [vmem:[#allocation6 + $0x18] sm:$0xff]  }
  0x81   : > { %785 = vmatpush3.bf16.msra.mxu0 %v906_v1  ;;  %793 = vmatpush3.bf16.msra.mxu1 %v908_v11  ;;  %v912_v19 = vld [vmem:[#allocation6 + $0x20] sm:$0xff]   ;;  %v913_v20 = vld [vmem:[#allocation6 + $0x28] sm:$0xff]   ;;  %v914_v21 = vld [vmem:[#allocation6 + $0x30] sm:$0xff]   ;;  %s1404_s22 = smov (!%p280_p5, %s1143_s22), 1 }
  0x82   : > { %786 = vmatprep.subr.bf16.mxu0 %v1092_v0  ;;  %794 = vmatprep.subr.bf16.mxu1 %v1092_v0  ;;  %v915_v22 = vld [vmem:[#allocation6 + $0x38] sm:$0xff]   ;;  %v739_v30 = vld [vmem:[%s1383_s4 + $0x1] ss:$0 sm:$0xff]  ;;  %v740_v32 = vld [vmem:[%s1383_s4 + $0x2] ss:$0 sm:$0xff]  ;;  %s734_s27 = sshll.u32 %s1404_s22, 3 }
  0x83   : > { %v741_v37 = vld [vmem:[%s1383_s4 + $0x3] ss:$0 sm:$0xff]  ;;  %v917_v48 = vld [vmem:[#allocation7 + $0x8] sm:$0xff]   ;;  %v918_v49 = vld [vmem:[#allocation7 + $0x10] sm:$0xff]   ;;  %s283_s18 = scalar_lea.vmem %s1384_s5, %s734_s27 }
  0x84   : > { %v916_v43 = vld [vmem:[#allocation7] sm:$0xff]   ;;  %v919_v50 = vld [vmem:[#allocation7 + $0x18] sm:$0xff]   ;;  %v921_v52 = vld [vmem:[#allocation7 + $0x28] sm:$0xff]  }
  0x85   : > { %787 = vmatpush3.bf16.msra.mxu0 %v907_v2  ;;  %795 = vmatpush3.bf16.msra.mxu1 %v909_v16  ;;  %v920_v51 = vld [vmem:[#allocation7 + $0x20] sm:$0xff]   ;;  %v922_v53 = vld [vmem:[#allocation7 + $0x30] sm:$0xff]   ;;  %v923_v54 = vld [vmem:[#allocation7 + $0x38] sm:$0xff]  }
  0x86   : > { %812 = vmatprep.subr.bf16.mxu0 %v1092_v0  ;;  %796 = vmatprep.subr.bf16.mxu1 %v1092_v0  ;;  %v750_v62 = vld [vmem:[%s1383_s4 + $0x4] ss:$0 sm:$0xff] }
  0x88   : > { %789 = vmatmul.mubr.msk.bf16.vlgmr.msra.gmra.mrb[0].mxu0 %vm308_vm1, %v286_v4 }
  0x89   : > { %828 = vmatprep.mubr.msk.bf16.mxu0 %vm1093_vm0, %v1092_v0  ;;  %797 = vmatpush3.bf16.msra.mxu1 %v910_v17 }
  0x8a   : > { %798 = vmatprep.subr.bf16.mxu1 %v1092_v0  ;;  %813 = vmatpush3.bf16.msra.mxu0 %v916_v43 }
  0x8b   : > { %814 = vmatprep.subr.bf16.mxu0 %v1092_v0 }
  0x8d   : > { %799 = vmatpush3.bf16.msra.mxu1 %v911_v18 }
  0x8e   : > { %800 = vmatprep.subr.bf16.mxu1 %v1092_v0  ;;  %815 = vmatpush3.bf16.msra.mxu0 %v917_v48 }
  0x8f   : > { %816 = vmatprep.subr.bf16.mxu0 %v1092_v0 }
  0x91   : > { %801 = vmatpush3.bf16.msra.mxu1 %v912_v19 }
  0x92   : > { %802 = vmatprep.subr.bf16.mxu1 %v1092_v0  ;;  %817 = vmatpush3.bf16.msra.mxu0 %v918_v49 }
  0x93   : > { %818 = vmatprep.subr.bf16.mxu0 %v1092_v0 }
  0x95   : > { %803 = vmatpush3.bf16.msra.mxu1 %v913_v20 }
  0x96   : > { %804 = vmatprep.subr.bf16.mxu1 %v1092_v0  ;;  %819 = vmatpush3.bf16.msra.mxu0 %v919_v50 }
  0x97   : > { %820 = vmatprep.subr.bf16.mxu0 %v1092_v0 }
  0x99   : > { %805 = vmatpush3.bf16.msra.mxu1 %v914_v21 }
  0x9a   : > { %806 = vmatprep.subr.bf16.mxu1 %v1092_v0  ;;  %821 = vmatpush3.bf16.msra.mxu0 %v920_v51 }
  0x9b   : > { %822 = vmatprep.subr.bf16.mxu0 %v1092_v0 }
  0x9d   : > { %807 = vmatpush3.bf16.msra.mxu1 %v915_v22 }
  0x9e   : > { %823 = vmatpush3.bf16.msra.mxu0 %v921_v52 }
  0x9f   : > { %824 = vmatprep.subr.bf16.mxu0 %v1092_v0 }
  0xa2   : > { %825 = vmatpush3.bf16.msra.mxu0 %v922_v53 }
  0xa3   : > { %826 = vmatprep.subr.bf16.mxu0 %v1092_v0  ;;  %v751_v0 = vld [vmem:[%s1383_s4 + $0x5] ss:$0 sm:$0xff] }
  0xa6   : > { %827 = vmatpush3.bf16.msra.mxu0 %v923_v54 }
 0x15b   : > { %v346_v6 = vpop.f32.mrb[0].mxu0 }
 0x15c   : > { %v347_v7 = vadd.f32 %v735_v5, %v346_v6  ;;  %v790_v8 = vpop.f32.mrb[1].mxu0  ;;  %v752_v5 = vld [vmem:[%s1383_s4 + $0x6] ss:$0 sm:$0xff] }
 0x15d   : > { %v349_v9 = vpop.f32.mrb[2].mxu0 }
 0x15e   : > { %352 = vadd.xlane.f32.xlu0 %v347_v7  ;;  %v791_v10 = vpop.f32.mrb[3].mxu0 }
 0x1eb   : > { %v353_v12 = vpop.xlane.xlu0 %352 }
 0x1ec   : > { %v354_v13 = vmul.f32 0.015625, %v353_v12 }
 0x1ee   : > { %v355_v14 = vsub.f32 %v347_v7, %v354_v13  ;;  %v359_v23 = vmul.f32 %v354_v13, %v354_v13 }
 0x1f0   : > { %v356_v15 = vmul.f32 %v355_v14, %v355_v14  ;;  %v360_v24 = vmul.f32 64.0, %v359_v23 }
 0x1f2   : > { %357 = vadd.xlane.f32.xlu0 %v356_v15 }
 0x27f   : > { %v358_v25 = vpop.xlane.xlu0 %357 }
 0x280   : > { %v361_v26 = vsub.f32 %v358_v25, %v360_v24 }
 0x282   : > { %v362_v27 = vmul.f32 0.015625, %v361_v26 }
 0x284   : > { %v363_v28 = vadd.f32 1e-05, %v362_v27 }
 0x286   : > { %924 = vrsqrt.f32 %v363_v28 }
 0x290   : > { %v925_v29 = vpop.eup %924 }
 0x291   : > { %v367_v31 = vmul.f32 %v925_v29, %v355_v14 }
 0x293   : > { %v372_v33 = vmul.f32 %v739_v30, %v367_v31 }
 0x295   : > { %v377_v34 = vadd.f32 %v740_v32, %v372_v33 }
 0x297   : > { %v378_v35 = vmax.f32 %v377_v34, 0.0 }
 0x299   : > { %v379_v36 = vpack.c.bf16 %v378_v35, %v378_v35 }
 0x29b   : > { %809 = vmatmul.mubr.bf16.vlgmr.msra.gmra.mrb[0].mxu1 %v379_v36 }
 0x36e   : > { %v483_v38 = vpop.f32.mrb[0].mxu1 }
 0x36f   : > { %v484_v39 = vadd.f32 %v741_v37, %v483_v38  ;;  %v810_v40 = vpop.f32.mrb[1].mxu1 }
 0x370   : > { %v486_v41 = vpop.f32.mrb[2].mxu1 }
 0x371   : > { %489 = vadd.xlane.f32.xlu1 %v484_v39  ;;  %v811_v42 = vpop.f32.mrb[3].mxu1 }
 0x3fe   : > { %v490_v44 = vpop.xlane.xlu1 %489 }
 0x3ff   : > { %v491_v45 = vmul.f32 0.03125, %v490_v44 }
 0x401   : > { %v492_v46 = vsub.f32 %v484_v39, %v491_v45  ;;  %v496_v55 = vmul.f32 %v491_v45, %v491_v45 }
 0x403   : > { %v493_v47 = vmul.f32 %v492_v46, %v492_v46  ;;  %v497_v56 = vmul.f32 96.0, %v496_v55 }
 0x405   : > { %494 = vadd.xlane.f32.xlu1 %v493_v47 }
 0x492   : > { %v495_v57 = vpop.xlane.xlu1 %494 }
 0x493   : > { %v498_v58 = vsub.f32 %v495_v57, %v497_v56 }
 0x495   : > { %v499_v59 = vmul.f32 0.03125, %v498_v58 }
 0x497   : > { %v500_v60 = vadd.f32 1e-05, %v499_v59 }
 0x499   : > { %926 = vrsqrt.f32 %v500_v60 }
 0x4a3   : > { %v927_v61 = vpop.eup %926 }
 0x4a4   : > { %v504_v63 = vmul.f32 %v927_v61, %v492_v46 }
 0x4a6   : > { %v509_v1 = vmul.f32 %v750_v62, %v504_v63 }
 0x4a8   : > { %v514_v2 = vadd.f32 %v751_v0, %v509_v1 }
 0x4aa   : > { %v515_v3 = vmax.f32 %v514_v2, 0.0 }
 0x4ac   : > { %v516_v4 = vpack.c.bf16 %v515_v3, %v515_v3 }
 0x4ae   : > { %829 = vmatmul.mubr.bf16.vlgmr.msra.gmra.mrb[4].mxu0 %v516_v4 }
 0x581   : > { %v620_v6 = vpop.f32.mrb[4].mxu0 }
 0x582   : > { %v621_v7 = vadd.f32 %v752_v5, %v620_v6  ;;  %v830_v8 = vpop.f32.mrb[5].mxu0 }
 0x583   : > { %v623_v9 = vpop.f32.mrb[6].mxu0 }
 0x584   : > { %626 = vst [vmem:[%s283_s18] sm:$0xff] %v621_v7  ;;  %v831_v10 = vpop.f32.mrb[7].mxu0 }
 0x585 PF: > { %p17_p9 = scmp.ge.s32.totalorder %s1254_s12, 4   ;;  %s1399_s18 = smov %s1076_s19 }
 0x586   : > { %s1400_s19 = smov %s1080_s20  ;;  %s1401_s20 = smov %s1264_s26 }
 0x587   : > { %s1402_s21 = smov %s1254_s12  ;;  %19 = sbr.rel (!%p17_p9) target bundleno = 5 (0x5), region = 92 }
 0x58e   :  { %646 = vsyncpa [#allocation3], 1 }
 0x58f   :  { %648 = vsyncpa [#allocation3 + $0x1], 1 }
 0x590   :  { %649 = vsyncpa [#allocation5], 1 }
 0x591   :  { %650 = vsyncpa [#allocation8], 1 }

</bundles_post_ra>
